<compile_context>
chip_gen: v7x
topology: tpu7x:2x2x1
jax: 0.10.0
libtpu: 0.0.40
codegen_flags: <defaults>
</compile_context>

<pallas_src>
import functools

import jax
import jax.numpy as jnp
from jax import lax
from jax.experimental import pallas as pl
from jax.experimental.pallas import tpu as pltpu


def _round_up(n, m):
    return ((n + m - 1) // m) * m


def _cdiv(a, b):
    return (a + b - 1) // b


def mlp_kernel(x_ref, w1t_ref, b1_ref, w2_ref, b2_ref, o_ref, *, chunk, n_chunks):
    # x_ref  : (TM, D)            f32  -- natural layout, streamed per grid step
    # w1t_ref: (H, D)             bf16 -- resident across grid steps
    # b1_ref : (H, 1)             f32
    # w2_ref : (H, 1)             f32
    # b2_ref : (1, 1)             f32
    # o_ref  : (n_chunks, chunk)  f32  -- lane-dense output rows, one per chunk
    H = w1t_ref.shape[0]
    w1t = w1t_ref[...]                                        # (H, D) bf16
    # Hoisted broadcasts (JAX does not CSE broadcast_in_dim inside the loop).
    b1_b = jnp.broadcast_to(b1_ref[...], (H, chunk))          # (H, chunk) f32
    w2_b = jnp.broadcast_to(w2_ref[...], (H, chunk))          # (H, chunk) f32
    b2_b = jnp.broadcast_to(b2_ref[...], (1, chunk))          # (1, chunk) f32

    @pl.loop(0, n_chunks)
    def _(c):
        start = pl.multiple_of(c * chunk, chunk)
        # (chunk, D) slice of the tile; bf16 cast happens in VMEM (no HBM cost).
        xb = x_ref[pl.ds(start, chunk), :].astype(jnp.bfloat16)
        # fc1 on the MXU: contract D of (H, D) with D of (chunk, D) -> (H, chunk).
        # Batch stays on the 128-lane axis, so the whole epilogue is lane-dense
        # and lives in ~8 vregs per chunk (no VMEM spill of the intermediate).
        h = lax.dot_general(w1t, xb, (((1,), (1,)), ((), ())),
                            preferred_element_type=jnp.float32)
        h = jnp.maximum(h + b1_b, 0.0)                        # bias + ReLU (VPU)
        # fc2: VPU multiply + 16-row sublane (XLU) reduction; MXU stays on fc1.
        z = jnp.sum(h * w2_b, axis=0, keepdims=True) + b2_b   # (1, chunk) f32
        # Exact sigmoid via a single EUP tanh.
        o_ref[pl.ds(c, 1), :] = 0.5 * (jnp.tanh(0.5 * z) + 1.0)


def simple_model_forward(x, w1, b1, w2, b2, *, block_batch=32768, chunk=512):
    """x: (B, D) float32. Weights stored as (in, out): w1 (D, 16), w2 (16, 1)."""
    x = jnp.asarray(x, jnp.float32)                  # matches torch's x.to(float32)
    B, D = x.shape
    H = w1.shape[1]                                  # hidden = 16

    chunk = _round_up(chunk, 128)
    B_ceil = _round_up(B, chunk)
    # Batch tile = multiple of the lane-chunk, capped by block_batch.
    TM = max(chunk, min(_round_up(block_batch, chunk), B_ceil))
    num_tiles = _cdiv(B_ceil, TM)
    # v7x: guarantee >= 2 grid steps when the batch allows it, so the "parallel"
    # grid axis shards tiles across its two TensorCores (no-op on v5e/v6e).
    if num_tiles < 2 and B_ceil >= 2 * chunk:
        num_tiles = 2
    # Balance tiles over the (chunk-rounded) batch to avoid over-padding.
    TM = _round_up(_cdiv(B_ceil, num_tiles), chunk)
    num_tiles = _cdiv(B_ceil, TM)
    n_chunks = TM // chunk

    # Tiny (<=2 KiB) weight reshapes/casts; x itself is NOT touched in the wrapper.
    w1t = jnp.asarray(w1, jnp.float32).T.astype(jnp.bfloat16)   # (H, D) MXU LHS
    b1c = jnp.asarray(b1, jnp.float32).reshape(H, 1)
    w2c = jnp.asarray(w2, jnp.float32).reshape(H, 1)
    b2c = jnp.asarray(b2, jnp.float32).reshape(1, 1)

    kernel = functools.partial(mlp_kernel, chunk=chunk, n_chunks=n_chunks)

    out = pl.pallas_call(
        kernel,
        out_shape=jax.ShapeDtypeStruct((num_tiles, n_chunks, chunk), jnp.float32),
        grid=(num_tiles,),
        in_specs=[
            # x streamed once in natural layout; the ragged last tile (rows >= B)
            # is handled by Pallas (OOB rows are garbage, sliced off below).
            pl.BlockSpec((TM, D), lambda i: (i, 0)),
            # Weights / biases: constant index_map -> DMA'd once, stay resident.
            pl.BlockSpec((H, D), lambda i: (0, 0)),
            pl.BlockSpec((H, 1), lambda i: (0, 0)),
            pl.BlockSpec((H, 1), lambda i: (0, 0)),
            pl.BlockSpec((1, 1), lambda i: (0, 0)),
        ],
        out_specs=pl.BlockSpec((None, n_chunks, chunk), lambda i: (i, 0, 0)),
        compiler_params=pltpu.CompilerParams(
            dimension_semantics=("parallel",),           # 2 TC shards on v7x
            vmem_limit_bytes=32 * 1024 * 1024,           # above v5e's 16 MiB default
        ),
    )(x, w1t, b1c, w2c, b2c)

    # Row-major (tile, chunk, lane) flatten == batch order; drop padded rows.
    return out.reshape(-1)[:B].reshape(B, 1)


def init_params(input_size, key):
    # Deterministic synthetic init mimicking nn.Linear's U(-1/sqrt(fan_in), +1/sqrt(fan_in)).
    k1, k2, k3, k4 = jax.random.split(key, 4)
    lim1 = 1.0 / jnp.sqrt(jnp.float32(input_size))
    lim2 = 1.0 / jnp.sqrt(jnp.float32(16))
    w1 = jax.random.uniform(k1, (input_size, 16), jnp.float32, -lim1, lim1)
    b1 = jax.random.uniform(k2, (1, 16), jnp.float32, -lim1, lim1)
    w2 = jax.random.uniform(k3, (16, 1), jnp.float32, -lim2, lim2)
    b2 = jax.random.uniform(k4, (1, 1), jnp.float32, -lim2, lim2)
    return w1, b1, w2, b2


if __name__ == "__main__":
    key = jax.random.PRNGKey(0)
    kx, kp, kx2 = jax.random.split(key, 3)

    input_size = 32
    w1, b1, w2, b2 = init_params(input_size, kp)

    def ref_f32(xv):
        return jax.nn.sigmoid(jnp.maximum(xv @ w1 + b1, 0.0) @ w2 + b2)

    def ref_bf16(xv):
        # bf16-matched reference (kernel feeds the MXU bf16 x / bf16 w1, f32 acc).
        h = jnp.dot(xv.astype(jnp.bfloat16), w1.astype(jnp.bfloat16),
                    preferred_element_type=jnp.float32) + b1
        return jax.nn.sigmoid(jnp.maximum(h, 0.0) @ w2 + b2)

    # Small case (PyTorch demo scale): single tile, single in-kernel chunk.
    x_small = jax.random.normal(kx, (8, input_size), jnp.float32)
    out_small = jax.block_until_ready(simple_model_forward(x_small, w1, b1, w2, b2))
    assert out_small.shape == (8, 1)
    assert jnp.allclose(out_small, ref_bf16(x_small), atol=2e-3), \
        float(jnp.max(jnp.abs(out_small - ref_bf16(x_small))))
    assert jnp.allclose(out_small, ref_f32(x_small), atol=1e-2), \
        float(jnp.max(jnp.abs(out_small - ref_f32(x_small))))

    # Larger ragged case: exercises the multi-tile grid, the in-kernel chunk
    # loop, and the ragged (out-of-bounds) final input block.
    x_big = jax.random.normal(kx2, (1600, input_size), jnp.float32)
    out_big = jax.block_until_ready(simple_model_forward(x_big, w1, b1, w2, b2))
    assert out_big.shape == (1600, 1)
    assert jnp.allclose(out_big, ref_bf16(x_big), atol=2e-3), \
        float(jnp.max(jnp.abs(out_big - ref_bf16(x_big))))
    assert jnp.allclose(out_big, ref_f32(x_big), atol=1e-2), \
        float(jnp.max(jnp.abs(out_big - ref_f32(x_big))))

    print("KERNEL_OK")
</pallas_src>

<mosaic_0001>
module attributes {stable_mosaic.version = 11 : i64} {
  func.func @mlp_kernel(%arg0: i32, %arg1: memref<512x32xf32, #tpu.memory_space<vmem>>, %arg2: memref<16x32xbf16, #tpu.memory_space<vmem>>, %arg3: memref<16x1xf32, #tpu.memory_space<vmem>>, %arg4: memref<16x1xf32, #tpu.memory_space<vmem>>, %arg5: memref<1x1xf32, #tpu.memory_space<vmem>>, %arg6: memref<1x1x512xf32, #tpu.memory_space<vmem>>) attributes {dimension_semantics = [#tpu.dimension_semantics<parallel>], iteration_bounds = array<i64: 1>, scalar_prefetch = 0 : i64, scratch_operands = 0 : i64, tpu.core_type = #tpu.core_type<tc>, window_params = [{transform_indices = @transform_0, window_bounds = array<i64: 512, 32>}, {pipeline_mode = #tpu.pipeline_mode<synchronous>, transform_indices = @transform_1, window_bounds = array<i64: 16, 32>}, {pipeline_mode = #tpu.pipeline_mode<synchronous>, transform_indices = @transform_2, window_bounds = array<i64: 16, 1>}, {pipeline_mode = #tpu.pipeline_mode<synchronous>, transform_indices = @transform_3, window_bounds = array<i64: 16, 1>}, {pipeline_mode = #tpu.pipeline_mode<synchronous>, transform_indices = @transform_4, window_bounds = array<i64: 1, 1>}, {transform_indices = @transform_5, window_bounds = array<i64: 1, 1, 512>}]} {
    %c0 = arith.constant 0 : index
    %c0_0 = arith.constant 0 : index
    %0 = vector.load %arg2[%c0, %c0_0] : memref<16x32xbf16, #tpu.memory_space<vmem>>, vector<16x32xbf16>
    %c0_1 = arith.constant 0 : index
    %c0_2 = arith.constant 0 : index
    %1 = vector.load %arg3[%c0_1, %c0_2] : memref<16x1xf32, #tpu.memory_space<vmem>>, vector<16x1xf32>
    %2 = vector.shape_cast %1 : vector<16x1xf32> to vector<16x1xf32>
    %3 = vector.broadcast %2 : vector<16x1xf32> to vector<16x512xf32>
    %c0_3 = arith.constant 0 : index
    %c0_4 = arith.constant 0 : index
    %4 = vector.load %arg4[%c0_3, %c0_4] : memref<16x1xf32, #tpu.memory_space<vmem>>, vector<16x1xf32>
    %5 = vector.shape_cast %4 : vector<16x1xf32> to vector<16x1xf32>
    %6 = vector.broadcast %5 : vector<16x1xf32> to vector<16x512xf32>
    %c0_5 = arith.constant 0 : index
    %c0_6 = arith.constant 0 : index
    %7 = vector.load %arg5[%c0_5, %c0_6] : memref<1x1xf32, #tpu.memory_space<vmem>>, vector<1x1xf32>
    %8 = vector.shape_cast %7 : vector<1x1xf32> to vector<1x1xf32>
    %9 = vector.broadcast %8 : vector<1x1xf32> to vector<1x512xf32>
    %c0_i32 = arith.constant 0 : i32
    %c1_i32 = arith.constant 1 : i32
    %10 = arith.muli %c0_i32, %c1_i32 : i32
    %c0_i32_7 = arith.constant 0 : i32
    %11 = arith.addi %c0_i32_7, %10 : i32
    %c512_i32 = arith.constant 512 : i32
    %12 = arith.muli %11, %c512_i32 : i32
    %13 = tpu.assume_multiple %12, 512 : i32
    %14 = arith.index_cast %13 : i32 to index
    %c0_8 = arith.constant 0 : index
    %15 = vector.load %arg1[%14, %c0_8] : memref<512x32xf32, #tpu.memory_space<vmem>>, vector<512x32xf32>
    %16 = arith.truncf %15 : vector<512x32xf32> to vector<512x32xbf16>
    %cst = arith.constant dense<0.000000e+00> : vector<16x512xf32>
    %17 = tpu.matmul %0, %16, %cst {dimension_numbers = #tpu.dot_dimension_numbers<[1], [1], [0], [0], [0, 0, 1, 0], [], []>} : vector<16x32xbf16>, vector<512x32xbf16>, vector<16x512xf32> -> vector<16x512xf32>
    %18 = arith.addf %17, %3 : vector<16x512xf32>
    %cst_9 = arith.constant 0.000000e+00 : f32
    %19 = vector.broadcast %cst_9 : f32 to vector<16x512xf32>
    %20 = arith.maximumf %18, %19 : vector<16x512xf32>
    %21 = arith.mulf %20, %6 : vector<16x512xf32>
    %cst_10 = arith.constant dense<0.000000e+00> : vector<512xf32>
    %22 = vector.multi_reduction <add>, %21, %cst_10 [0] : vector<16x512xf32> to vector<512xf32>
    %23 = vector.shape_cast %22 : vector<512xf32> to vector<1x512xf32>
    %24 = arith.addf %23, %9 : vector<1x512xf32>
    %cst_11 = arith.constant 5.000000e-01 : f32
    %25 = vector.broadcast %cst_11 : f32 to vector<1x512xf32>
    %26 = arith.mulf %25, %24 : vector<1x512xf32>
    %27 = math.tanh %26 : vector<1x512xf32>
    %cst_12 = arith.constant 1.000000e+00 : f32
    %28 = vector.broadcast %cst_12 : f32 to vector<1x512xf32>
    %29 = arith.addf %27, %28 : vector<1x512xf32>
    %cst_13 = arith.constant 5.000000e-01 : f32
    %30 = vector.broadcast %cst_13 : f32 to vector<1x512xf32>
    %31 = arith.mulf %30, %29 : vector<1x512xf32>
    %c0_14 = arith.constant 0 : index
    %32 = arith.index_cast %11 : i32 to index
    %c0_15 = arith.constant 0 : index
    %33 = vector.load %arg6[%c0_14, %32, %c0_15] : memref<1x1x512xf32, #tpu.memory_space<vmem>>, vector<1x1x512xf32>
    %34 = vector.shape_cast %33 : vector<1x1x512xf32> to vector<1x512xf32>
    %35 = vector.shape_cast %31 : vector<1x512xf32> to vector<1x1x512xf32>
    tpu.vector_store %arg6[%c0_14, %32, %c0_15], %35 {strides = array<i32>} : memref<1x1x512xf32, #tpu.memory_space<vmem>>, vector<1x1x512xf32>,
    %c1_i32_16 = arith.constant 1 : i32
    return
  }
  func.func @transform_0(%arg0: i32) -> (i32, i32) {
    %c0_i32 = arith.constant 0 : i32
    %c0_i32_0 = arith.constant 0 : i32
    return %arg0, %c0_i32 : i32, i32
  }
  func.func @transform_1(%arg0: i32) -> (i32, i32) {
    %c0_i32 = arith.constant 0 : i32
    %c0_i32_0 = arith.constant 0 : i32
    %c0_i32_1 = arith.constant 0 : i32
    return %c0_i32, %c0_i32_0 : i32, i32
  }
  func.func @transform_2(%arg0: i32) -> (i32, i32) {
    %c0_i32 = arith.constant 0 : i32
    %c0_i32_0 = arith.constant 0 : i32
    %c0_i32_1 = arith.constant 0 : i32
    return %c0_i32, %c0_i32_0 : i32, i32
  }
  func.func @transform_3(%arg0: i32) -> (i32, i32) {
    %c0_i32 = arith.constant 0 : i32
    %c0_i32_0 = arith.constant 0 : i32
    %c0_i32_1 = arith.constant 0 : i32
    return %c0_i32, %c0_i32_0 : i32, i32
  }
  func.func @transform_4(%arg0: i32) -> (i32, i32) {
    %c0_i32 = arith.constant 0 : i32
    %c0_i32_0 = arith.constant 0 : i32
    %c0_i32_1 = arith.constant 0 : i32
    return %c0_i32, %c0_i32_0 : i32, i32
  }
  func.func @transform_5(%arg0: i32) -> (i32, i32, i32) {
    %c0_i32 = arith.constant 0 : i32
    %c0_i32_0 = arith.constant 0 : i32
    %c0_i32_1 = arith.constant 0 : i32
    return %arg0, %c0_i32, %c0_i32_0 : i32, i32, i32
  }
}

</mosaic_0001>

<bundles_post_ra>
// kernel: tpu_custom_call.1
= control target key start
LH: loop header
LB: loop body
LE: loop exit
PB: predicated region body
PF: predicated region fallthrough
CT: control target
= control target key end

     0   :  { %s851_s0 = inlined_call_operand.vmem [shape: f32[8,32], index: 0, kind: input, shape index: {}]   ;;  %s852_s1 = inlined_call_operand.vmem [shape: bf16[16,32], index: 1, kind: input, shape index: {}]   ;;  %s853_s2 = inlined_call_operand.vmem [shape: f32[16,1], index: 2, kind: input, shape index: {}]   ;;  %s854_s3 = inlined_call_operand.vmem [shape: f32[16,1], index: 3, kind: input, shape index: {}]   ;;  %s855_s4 = inlined_call_operand.<no memory space> [shape: f32[1,1], index: 4, kind: input, shape index: {}]   ;;  %s856_s5 = inlined_call_operand.hbm [shape: f32[1,1,512], index: 5, kind: output, shape index: {}]  }
   0x1   :  { %v10_v0 = vstv %s855_s4 }
   0x2   :  { %11 = vst [vmem:[#allocation2] sm:$0x1] %v10_v0 }
   0x3   :  { %v76_v1 = vld [vmem:[%s851_s0 + $0x80] sm:$0xff]  ;;  %v77_v2 = vld [vmem:[%s851_s0 + $0x88] sm:$0xff]  ;;  %vm161_vm0 = vcmask 261120   ;;  %v552_v8 = vmov 0   ;;  %v78_v13 = vld [vmem:[%s851_s0 + $0x90] sm:$0xff] }
   0x4   :  { %v108_v3 = vld [vmem:[%s851_s0 + $0x180] sm:$0xff]  ;;  %v132_v4 = vpack.c.bf16 %v77_v2, %v76_v1  ;;  %v109_v5 = vld [vmem:[%s851_s0 + $0x188] sm:$0xff]  ;;  %517 = vset.pattern.permute.xlu0 %v552_v8  ;;  %518 = vset.pattern.permute.xlu1 %v552_v8  ;;  %v79_v15 = vld [vmem:[%s851_s0 + $0x98] sm:$0xff] }
   0x5   :  { %v60_v6 = vld [vmem:[%s851_s0] sm:$0xff]  ;;  %v61_v7 = vld [vmem:[%s851_s0 + $0x8] sm:$0xff]  ;;  %v148_v9 = vpack.c.bf16 %v109_v5, %v108_v3  ;;  %v110_v16 = vld [vmem:[%s851_s0 + $0x190] sm:$0xff]  ;;  %v133_v19 = vpack.c.bf16 %v79_v15, %v78_v13 }
   0x6   :  { %v124_v10 = vpack.c.bf16 %v61_v7, %v60_v6  ;;  %v92_v11 = vld [vmem:[%s851_s0 + $0x100] sm:$0xff]  ;;  %v93_v12 = vld [vmem:[%s851_s0 + $0x108] sm:$0xff]  ;;  %498 = vmatprep.subr.msk.bf16.mxu0 %vm161_vm0, %v132_v4  ;;  %v111_v17 = vld [vmem:[%s851_s0 + $0x198] sm:$0xff] }
   0x7   :  { %v140_v14 = vpack.c.bf16 %v93_v12, %v92_v11  ;;  %506 = vmatprep.subr.msk.bf16.mxu1 %vm161_vm0, %v148_v9  ;;  %v149_v20 = vpack.c.bf16 %v111_v17, %v110_v16  ;;  %v62_v21 = vld [vmem:[%s851_s0 + $0x10] sm:$0xff]  ;;  %v63_v22 = vld [vmem:[%s851_s0 + $0x18] sm:$0xff]  ;;  %v80_v28 = vld [vmem:[%s851_s0 + $0xa0] sm:$0xff] }
   0x8   :  { %v166_v18 = vsel %vm161_vm0, %v124_v10, 0  ;;  %v94_v23 = vld [vmem:[%s851_s0 + $0x110] sm:$0xff]  ;;  %v95_v25 = vld [vmem:[%s851_s0 + $0x118] sm:$0xff]  ;;  %v125_v26 = vpack.c.bf16 %v63_v22, %v62_v21  ;;  %v81_v29 = vld [vmem:[%s851_s0 + $0xa8] sm:$0xff] }
   0x9   :  { %463 = vmatpush3.bf16.xpose.msra.mxu0 %v166_v18  ;;  %v214_v24 = vsel %vm161_vm0, %v140_v14, 0  ;;  %v141_v27 = vpack.c.bf16 %v95_v25, %v94_v23  ;;  %v112_v30 = vld [vmem:[%s851_s0 + $0x1a0] sm:$0xff]  ;;  %v113_v31 = vld [vmem:[%s851_s0 + $0x1a8] sm:$0xff]  ;;  %v134_v33 = vpack.c.bf16 %v81_v29, %v80_v28  ;;  %v82_v42 = vld [vmem:[%s851_s0 + $0xb0] sm:$0xff] }
   0xa   :  { %481 = vmatpush3.bf16.xpose.msra.mxu1 %v214_v24  ;;  %499 = vmatprep.subr.msk.bf16.mxu0 %vm161_vm0, %v133_v19  ;;  %v169_v32 = vsel %vm161_vm0, %v125_v26, 0  ;;  %v150_v35 = vpack.c.bf16 %v113_v31, %v112_v30  ;;  %v64_v36 = vld [vmem:[%s851_s0 + $0x20] sm:$0xff]  ;;  %v65_v37 = vld [vmem:[%s851_s0 + $0x28] sm:$0xff]  ;;  %v83_v43 = vld [vmem:[%s851_s0 + $0xb8] sm:$0xff] }
   0xb   :  { %507 = vmatprep.subr.msk.bf16.mxu1 %vm161_vm0, %v149_v20  ;;  %v217_v34 = vsel %vm161_vm0, %v141_v27, 0  ;;  %v96_v38 = vld [vmem:[%s851_s0 + $0x120] sm:$0xff]  ;;  %v97_v39 = vld [vmem:[%s851_s0 + $0x128] sm:$0xff]  ;;  %v126_v40 = vpack.c.bf16 %v65_v37, %v64_v36  ;;  %v114_v44 = vld [vmem:[%s851_s0 + $0x1b0] sm:$0xff]  ;;  %v135_v47 = vpack.c.bf16 %v83_v43, %v82_v42 }
   0xc   :  { %v142_v41 = vpack.c.bf16 %v97_v39, %v96_v38  ;;  %v115_v45 = vld [vmem:[%s851_s0 + $0x1b8] sm:$0xff]  ;;  %v66_v50 = vld [vmem:[%s851_s0 + $0x30] sm:$0xff]  ;;  %v84_v55 = vld [vmem:[%s851_s0 + $0xc0] sm:$0xff] }
   0xd   :  { %v172_v46 = vsel %vm161_vm0, %v126_v40, 0  ;;  %v151_v49 = vpack.c.bf16 %v115_v45, %v114_v44  ;;  %v67_v51 = vld [vmem:[%s851_s0 + $0x38] sm:$0xff]  ;;  %v98_v52 = vld [vmem:[%s851_s0 + $0x130] sm:$0xff]  ;;  %v703_v56 = vld [vmem:[%s852_s1] sm:$0xff]  }
   0xe   :  { %v220_v48 = vsel %vm161_vm0, %v142_v41, 0  ;;  %v99_v53 = vld [vmem:[%s851_s0 + $0x138] sm:$0xff]  ;;  %v127_v54 = vpack.c.bf16 %v67_v51, %v66_v50  ;;  %v26_v57 = vld [vmem:[%s853_s2] sm:$0xff]  ;;  %v85_v59 = vld [vmem:[%s851_s0 + $0xc8] sm:$0xff]  ;;  %478 = vmatprep.mubr.msk.bf16.mxu0 %vm161_vm0, %v703_v56  ;;  %496 = vmatprep.mubr.msk.bf16.mxu1 %vm161_vm0, %v703_v56 }
   0xf   :  { %v143_v58 = vpack.c.bf16 %v99_v53, %v98_v52  ;;  %v116_v60 = vld [vmem:[%s851_s0 + $0x1c0] sm:$0xff]  ;;  %30 = vperm.xlu0 %517, %v26_v57   ;;  %v117_v62 = vld [vmem:[%s851_s0 + $0x1c8] sm:$0xff] }
  0x10   :  { %v38_v61 = vld [vmem:[%s854_s3] sm:$0xff]  ;;  %v27_v63 = vld [vmem:[%s853_s2 + $0x8] sm:$0xff] }
  0x11   :  { %465 = vmatpush3.bf16.xpose.msra.mxu0 %v169_v32 }
  0x12   :  { %483 = vmatpush3.bf16.xpose.msra.mxu1 %v217_v34  ;;  %500 = vmatprep.subr.msk.bf16.mxu0 %vm161_vm0, %v134_v33 }
  0x13   :  { %508 = vmatprep.subr.msk.bf16.mxu1 %vm161_vm0, %v150_v35 }
  0x19   :  { %467 = vmatpush3.bf16.xpose.msra.mxu0 %v172_v46 }
  0x1a   :  { %485 = vmatpush3.bf16.xpose.msra.mxu1 %v220_v48  ;;  %501 = vmatprep.subr.msk.bf16.mxu0 %vm161_vm0, %v135_v47 }
  0x1b   :  { %509 = vmatprep.subr.msk.bf16.mxu1 %vm161_vm0, %v151_v49 }
  0x1c   :  { %12 = vsyncpa [#allocation4], 0  ;;  %42 = vperm.xlu1 %518, %v38_v61   ;;  %v175_v0 = vsel %vm161_vm0, %v127_v54, 0  ;;  %v136_v1 = vpack.c.bf16 %v85_v59, %v84_v55  ;;  %v39_v2 = vld [vmem:[%s854_s3 + $0x8] sm:$0xff]  ;;  %v223_v3 = vsel %vm161_vm0, %v143_v58, 0  ;;  %v152_v4 = vpack.c.bf16 %v117_v62, %v116_v60  ;;  %v68_v5 = vld [vmem:[%s851_s0 + $0x40] sm:$0xff]  ;;  %35 = vperm.xlu0 %517, %v27_v63  }
  0x1d   :  { %v69_v6 = vld [vmem:[%s851_s0 + $0x48] sm:$0xff]  ;;  %v100_v7 = vld [vmem:[%s851_s0 + $0x140] sm:$0xff]  ;;  %v86_v12 = vld [vmem:[%s851_s0 + $0xd0] sm:$0xff] }
  0x1e   :  { %v101_v8 = vld [vmem:[%s851_s0 + $0x148] sm:$0xff]  ;;  %v50_v9 = vld [vmem:[#allocation2] sm:$0x1]  ;;  %v128_v10 = vpack.c.bf16 %v69_v6, %v68_v5  ;;  %v87_v13 = vld [vmem:[%s851_s0 + $0xd8] sm:$0xff] }
  0x1f   :  { %v144_v11 = vpack.c.bf16 %v101_v8, %v100_v7  ;;  %v118_v14 = vld [vmem:[%s851_s0 + $0x1d0] sm:$0xff]  ;;  %v119_v15 = vld [vmem:[%s851_s0 + $0x1d8] sm:$0xff]  ;;  %v137_v17 = vpack.c.bf16 %v87_v13, %v86_v12  ;;  %v88_v26 = vld [vmem:[%s851_s0 + $0xe0] sm:$0xff] }
  0x20   :  { %47 = vperm.xlu1 %518, %v39_v2   ;;  %53 = vperm.xlu0 %517, %v50_v9   ;;  %v178_v16 = vsel %vm161_vm0, %v128_v10, 0  ;;  %v153_v19 = vpack.c.bf16 %v119_v15, %v118_v14  ;;  %v70_v20 = vld [vmem:[%s851_s0 + $0x50] sm:$0xff]  ;;  %v71_v21 = vld [vmem:[%s851_s0 + $0x58] sm:$0xff]  ;;  %v89_v27 = vld [vmem:[%s851_s0 + $0xe8] sm:$0xff] }
  0x21   :  { %469 = vmatpush3.bf16.xpose.msra.mxu0 %v175_v0  ;;  %v226_v18 = vsel %vm161_vm0, %v144_v11, 0  ;;  %v102_v22 = vld [vmem:[%s851_s0 + $0x150] sm:$0xff]  ;;  %v103_v23 = vld [vmem:[%s851_s0 + $0x158] sm:$0xff]  ;;  %v129_v24 = vpack.c.bf16 %v71_v21, %v70_v20  ;;  %v120_v28 = vld [vmem:[%s851_s0 + $0x1e0] sm:$0xff]  ;;  %v138_v31 = vpack.c.bf16 %v89_v27, %v88_v26  ;;  %v56_v26 = vlaneseq }
  0x22   :  { %487 = vmatpush3.bf16.xpose.msra.mxu1 %v223_v3  ;;  %502 = vmatprep.subr.msk.bf16.mxu0 %vm161_vm0, %v136_v1  ;;  %v145_v25 = vpack.c.bf16 %v103_v23, %v102_v22  ;;  %v121_v29 = vld [vmem:[%s851_s0 + $0x1e8] sm:$0xff]  ;;  %v72_v34 = vld [vmem:[%s851_s0 + $0x60] sm:$0xff]  ;;  %v90_v40 = vld [vmem:[%s851_s0 + $0xf0] sm:$0xff] }
  0x23   :  { %510 = vmatprep.subr.msk.bf16.mxu1 %vm161_vm0, %v152_v4  ;;  %v181_v30 = vsel %vm161_vm0, %v129_v24, 0  ;;  %v154_v33 = vpack.c.bf16 %v121_v29, %v120_v28  ;;  %v73_v35 = vld [vmem:[%s851_s0 + $0x68] sm:$0xff]  ;;  %v104_v36 = vld [vmem:[%s851_s0 + $0x160] sm:$0xff]  ;;  %v91_v41 = vld [vmem:[%s851_s0 + $0xf8] sm:$0xff]  ;;  %vm442_vm1 = vcmp.lt.s32.totalorder %v56_v26, 512 }
  0x24   :  { %v229_v32 = vsel %vm161_vm0, %v145_v25, 0  ;;  %v105_v37 = vld [vmem:[%s851_s0 + $0x168] sm:$0xff]  ;;  %v130_v38 = vpack.c.bf16 %v73_v35, %v72_v34  ;;  %v122_v42 = vld [vmem:[%s851_s0 + $0x1f0] sm:$0xff]  ;;  %v123_v43 = vld [vmem:[%s851_s0 + $0x1f8] sm:$0xff]  ;;  %v139_v45 = vpack.c.bf16 %v91_v41, %v90_v40 }
  0x25   :  { %v146_v39 = vpack.c.bf16 %v105_v37, %v104_v36  ;;  %v155_v47 = vpack.c.bf16 %v123_v43, %v122_v42  ;;  %v74_v48 = vld [vmem:[%s851_s0 + $0x70] sm:$0xff]  ;;  %v75_v49 = vld [vmem:[%s851_s0 + $0x78] sm:$0xff]  ;;  %v57_v36 = vshrl.u32 %v56_v26, 7 }
  0x26   :  { %v184_v44 = vsel %vm161_vm0, %v130_v38, 0  ;;  %v106_v50 = vld [vmem:[%s851_s0 + $0x170] sm:$0xff]  ;;  %v107_v51 = vld [vmem:[%s851_s0 + $0x178] sm:$0xff]  ;;  %v131_v52 = vpack.c.bf16 %v75_v49, %v74_v48  ;;  %s554_s0 = smov [#allocation3]  }
  0x27   :  { %v232_v46 = vsel %vm161_vm0, %v146_v39, 0  ;;  %v147_v53 = vpack.c.bf16 %v107_v51, %v106_v50  ;;  %s451_s21 = sshll.u32 %s554_s0, 4  ;;  %s452_s21 = int_to_ptr.vmem [resolvable:$true] %s451_s21 }
  0x28   :  { %v187_v54 = vsel %vm161_vm0, %v131_v52, 0  ;;  %s528_s22 = scalar_lea.vmem %s452_s21, 64  ;;  %p533_p1 = scmp.lt.s32.totalorder %s452_s21, %s452_s21 }
  0x29   :  { %471 = vmatpush3.bf16.xpose.msra.mxu0 %v178_v16  ;;  %v235_v55 = vsel %vm161_vm0, %v147_v53, 0  ;;  %p529_p0 = scmp.ne.s32.totalorder %s452_s21, %s528_s22  ;;  %p534_p2 = scmp.lt.s32.totalorder %s528_s22, %s528_s22 }
  0x2a   :  { %489 = vmatpush3.bf16.xpose.msra.mxu1 %v226_v18  ;;  %503 = vmatprep.subr.msk.bf16.mxu0 %vm161_vm0, %v137_v17 }
  0x2b   :  { %511 = vmatprep.subr.msk.bf16.mxu1 %vm161_vm0, %v153_v19  ;;  %p535_p3 = por %p534_p2, %p533_p1 }
  0x2d   :  { %p536_p4 = pnand %p535_p3, %p529_p0 }
  0x31   :  { %473 = vmatpush3.bf16.xpose.msra.mxu0 %v181_v30 }
  0x32   :  { %491 = vmatpush3.bf16.xpose.msra.mxu1 %v229_v32  ;;  %504 = vmatprep.subr.msk.bf16.mxu0 %vm161_vm0, %v138_v31 }
  0x33   :  { %512 = vmatprep.subr.msk.bf16.mxu1 %vm161_vm0, %v154_v33 }
  0x39   :  { %475 = vmatpush3.bf16.xpose.msra.mxu0 %v184_v44 }
  0x3a   :  { %493 = vmatpush3.bf16.xpose.msra.mxu1 %v232_v46  ;;  %505 = vmatprep.subr.msk.bf16.mxu0 %vm161_vm0, %v139_v45  ;;  %v58_v45 = vsub.s32 0, %v57_v36 }
  0x3b   :  { %513 = vmatprep.subr.msk.bf16.mxu1 %vm161_vm0, %v155_v47 }
  0x41   :  { %477 = vmatpush3.bf16.xpose.msra.mxu0 %v187_v54 }
  0x42   :  { %495 = vmatpush3.bf16.xpose.msra.mxu1 %v235_v55 }
  0x48   :  { %479 = vmatmul.mubr.msk.bf16.vlgmr.msra.gmra.mrb[0].mxu0 %vm161_vm0, %v703_v56 }
  0x49   :  { %497 = vmatmul.mubr.msk.bf16.vlgmr.msra.gmra.mrb[0].mxu1 %vm161_vm0, %v703_v56 }
  0x8e   :  { %v31_v57 = vpop.permute.xlu0 %30 }
  0x9b   :  { %v43_v58 = vpop.permute.xlu1 %42  ;;  %v36_v59 = vpop.permute.xlu0 %35 }
  0x9f   :  { %v48_v17 = vpop.permute.xlu1 %47  ;;  %v54_v48 = vpop.permute.xlu0 %53 }
  0xa0   :  { %v59_v55 = vrot.slane %v54_v48, %v58_v45 }
 0x11b   :  { %v295_v60 = vpop.f32.mrb[0].mxu0 }
 0x11c   :  { %v296_v61 = vadd.f32 %v295_v60, %v31_v57  ;;  %v338_v62 = vpop.f32.mrb[0].mxu1  ;;  %v297_v63 = vpop.f32.mrb[1].mxu0 }
 0x11d   :  { %v339_v0 = vadd.f32 %v338_v62, %v31_v57  ;;  %v298_v1 = vadd.f32 %v297_v63, %v31_v57  ;;  %v340_v2 = vpop.f32.mrb[1].mxu1  ;;  %v299_v3 = vpop.f32.mrb[2].mxu0 }
 0x11e   :  { %v347_v4 = vmax.f32 %v296_v61, 0.0  ;;  %v341_v5 = vadd.f32 %v340_v2, %v31_v57  ;;  %v300_v6 = vadd.f32 %v299_v3, %v36_v59  ;;  %v342_v7 = vpop.f32.mrb[2].mxu1  ;;  %v301_v8 = vpop.f32.mrb[3].mxu0 }
 0x11f   :  { %v349_v9 = vmax.f32 %v339_v0, 0.0  ;;  %v348_v10 = vmax.f32 %v298_v1, 0.0  ;;  %v343_v11 = vadd.f32 %v342_v7, %v36_v59  ;;  %v302_v56 = vadd.f32 %v301_v8, %v36_v59  ;;  %v344_v12 = vpop.f32.mrb[3].mxu1 }
 0x120   :  { %v350_v13 = vmax.f32 %v341_v5, 0.0  ;;  %v351_v14 = vmax.f32 %v300_v6, 0.0  ;;  %v345_v15 = vadd.f32 %v344_v12, %v36_v59  ;;  %v355_v19 = vmul.f32 %v347_v4, %v43_v58 }
 0x121   :  { %v353_v16 = vmax.f32 %v343_v11, 0.0  ;;  %v352_v18 = vmax.f32 %v302_v56, 0.0  ;;  %v357_v22 = vmul.f32 %v349_v9, %v43_v58  ;;  %v356_v23 = vmul.f32 %v348_v10, %v43_v58 }
 0x122   :  { %v359_v20 = vmul.f32 %v351_v14, %v48_v17  ;;  %v354_v21 = vmax.f32 %v345_v15, 0.0  ;;  %v358_v27 = vmul.f32 %v350_v13, %v43_v58  ;;  %v553_v6 = vmov 1966171168  }
 0x123   :  { %v361_v24 = vmul.f32 %v353_v16, %v48_v17  ;;  %v360_v25 = vmul.f32 %v352_v18, %v48_v17  ;;  %v418_v7 = vunpack.c.l.s4 %v553_v6 }
 0x124   :  { %v363_v28 = vadd.f32 %v359_v20, %v355_v19  ;;  %v362_v29 = vmul.f32 %v354_v21, %v48_v17 }
 0x125   :  { %v377_v30 = vadd.f32 %v361_v24, %v357_v22  ;;  %v370_v31 = vadd.f32 %v360_v25, %v356_v23  ;;  %v419_v10 = vunpack.c.0.s8 %v418_v7 }
 0x126   :  { %v364_v32 = vrot.slane %v363_v28, 4  ;;  %v384_v33 = vadd.f32 %v362_v29, %v358_v27 }
 0x127   :  { %v378_v34 = vrot.slane %v377_v30, 4  ;;  %v371_v35 = vrot.slane %v370_v31, 4  ;;  %v422_v18 = vsub.s32 %v419_v10, %v57_v36 }
 0x128   :  { %v365_v37 = vadd.f32 %v364_v32, %v363_v28  ;;  %v385_v38 = vrot.slane %v384_v33, 4 }
 0x129   :  { %v379_v39 = vadd.f32 %v378_v34, %v377_v30  ;;  %v372_v40 = vadd.f32 %v371_v35, %v370_v31 }
 0x12a   :  { %v366_v41 = vrot.slane %v365_v37, 2  ;;  %v386_v42 = vadd.f32 %v385_v38, %v384_v33 }
 0x12b   :  { %v380_v43 = vrot.slane %v379_v39, 2  ;;  %v373_v44 = vrot.slane %v372_v40, 2 }
 0x12c   :  { %v367_v46 = vadd.f32 %v366_v41, %v365_v37  ;;  %v387_v47 = vrot.slane %v386_v42, 2 }
 0x12d   :  { %v381_v49 = vadd.f32 %v380_v43, %v379_v39  ;;  %v374_v50 = vadd.f32 %v373_v44, %v372_v40 }
 0x12e   :  { %v368_v51 = vrot.slane %v367_v46, 1  ;;  %v388_v52 = vadd.f32 %v387_v47, %v386_v42 }
 0x12f   :  { %v382_v53 = vrot.slane %v381_v49, 1  ;;  %v375_v54 = vrot.slane %v374_v50, 1 }
 0x130   :  { %v369_v57 = vadd.f32 %v368_v51, %v367_v46  ;;  %v389_v58 = vrot.slane %v388_v52, 1 }
 0x131   :  { %v383_v59 = vadd.f32 %v382_v53, %v381_v49  ;;  %v376_v60 = vadd.f32 %v375_v54, %v374_v50 }
 0x132   :  { %v391_v61 = vadd.f32 %v369_v57, %v59_v55  ;;  %v390_v62 = vadd.f32 %v389_v58, %v388_v52 }
 0x133   :  { %v393_v63 = vadd.f32 %v383_v59, %v59_v55  ;;  %v392_v0 = vadd.f32 %v376_v60, %v59_v55 }
 0x134   :  { %v395_v1 = vmul.f32 0.5, %v391_v61  ;;  %v394_v2 = vadd.f32 %v390_v62, %v59_v55 }
 0x135   :  { %v397_v3 = vmul.f32 0.5, %v393_v63  ;;  %v396_v4 = vmul.f32 0.5, %v392_v0 }
 0x136   :  { %520 = vtanh.f32 %v395_v1  ;;  %v398_v5 = vmul.f32 0.5, %v394_v2 }
 0x137   :  { %522 = vtanh.f32 %v397_v3 }
 0x138   :  { %524 = vtanh.f32 %v396_v4 }
 0x139   :  { %526 = vtanh.f32 %v398_v5 }
 0x140   :  { %v521_v8 = vpop.eup %520 }
 0x141   :  { %v523_v9 = vpop.eup %522  ;;  %v403_v11 = vadd.f32 1.0, %v521_v8 }
 0x142   :  { %v525_v56 = vpop.eup %524  ;;  %v405_v12 = vadd.f32 1.0, %v523_v9 }
 0x143   :  { %v527_v13 = vpop.eup %526  ;;  %v404_v14 = vadd.f32 1.0, %v525_v56  ;;  %v407_v15 = vmul.f32 0.5, %v403_v11 }
 0x144   :  { %v406_v16 = vadd.f32 1.0, %v527_v13  ;;  %v409_v17 = vmul.f32 0.5, %v405_v12 }
 0x145   :  { %v408_v19 = vmul.f32 0.5, %v404_v14 }
 0x146   :  { %v410_v20 = vmul.f32 0.5, %v406_v16 }
 0x147   :  { %v415_v21 = vcombine.low %v407_v15, %v408_v19 }
 0x148   :  { %v416_v22 = vcombine.low %v409_v17, %v410_v20 }
 0x149   :  { %v423_v23 = vrot.slane %v415_v21, %v422_v18 }
 0x14a   :  { %v430_v24 = vrot.slane %v416_v22, %v422_v18 }
 0x14c   :  { %v431_v25 = vcombine.low %v423_v23, %v430_v24 }
 0x14e   :  { %v438_v27 = vrot.slane %v431_v25, %v422_v18 }
 0x150   :  { %444 = vst.msk [vmem:[#allocation3] sm:$0xf] %vm442_vm1, %v438_v27 }
 0x151   :  { %539 = shalt.err (!%p536_p4)
}
 0x152   :  { %s540_s25 = scalar_lea.hbm %s856_s5, 64 }
 0x153   :  { %p541_p5 = scmp.ne.s32.totalorder %s856_s5, %s540_s25  ;;  %p544_p6 = scmp.lt.u32.totalorder %s540_s25, %s856_s5 }
 0x155   :  { %p546_p7 = pnand %p544_p6, %p541_p5 }
 0x157   :  { %549 = shalt.err (!%p546_p7)
}
 0x158   :  { %454 = dma.vmem_to_hbm [thread:$0]  %s452_s21, 64, %s856_s5, [#allocation4]  }
 0x159   :  { %550 = dma.done.wait [#allocation4], 64  }
 0x15a   :  { %551 = vsyncadd [#allocation4], 4294967232 }
 0x15b   :  { %458 = vsyncpa [#allocation4], 1 }

</bundles_post_ra>
